<compile_context>
chip_gen: v7x
topology: tpu7x:2x2x1
jax: 0.10.0
libtpu: 0.0.40
codegen_flags: <defaults>
</compile_context>

<pallas_src>
import functools

import jax
import jax.numpy as jnp
from jax.experimental import pallas as pl
from jax.experimental.pallas import tpu as pltpu

DEFAULT_DT = 0.01
DEFAULT_GAMMA = 0.8
DEFAULT_RF_THETA = 0.1
DEFAULT_RF_ADAPTIVE_B_offset_a = 0.0
DEFAULT_RF_ADAPTIVE_B_offset_b = 3.0

# Rows of the stacked per-neuron parameter slab (shape (8, L); rows 5-7 unused).
_ROW_COS, _ROW_SIN, _ROW_GAMMA, _ROW_B0DT, _ROW_DT = 0, 1, 2, 3, 4


def _adbrf_ii_kernel(x_ref, wdt_ref, z_ref, u_ref, v_ref, q_ref, p_ref,
                     z_out, u_out, v_out, q_out, acc_ref, *, theta):
    k = pl.program_id(2)

    @pl.when(k == 0)
    def _():
        acc_ref[...] = jnp.zeros_like(acc_ref)

    # MXU: accumulate in_sum * dt == x @ (W * dt) over the K (input) tiles.
    acc_ref[...] += jnp.dot(x_ref[...], wdt_ref[...],
                            preferred_element_type=jnp.float32)

    @pl.when(k == pl.num_programs(2) - 1)
    def _():
        in_sum_dt = acc_ref[...]                       # (TB, TL) f32
        u_ = u_ref[...]
        v_ = v_ref[...]
        q_ = q_ref[...]
        z_ = z_ref[...]
        p = p_ref[...]                                 # (8, TL) param slab
        cos_wdt = p[_ROW_COS:_ROW_COS + 1, :]          # (1, TL), broadcast rows
        sin_wdt = p[_ROW_SIN:_ROW_SIN + 1, :]
        gamma = p[_ROW_GAMMA:_ROW_GAMMA + 1, :]
        b0dt = p[_ROW_B0DT:_ROW_B0DT + 1, :]
        dt = p[_ROW_DT:_ROW_DT + 1, :]

        # exp((b_0 - q_) * dt) == exp(b_0*dt - q_*dt); b_0*dt precomputed.
        exp_bdt = jnp.exp(b0dt - q_ * dt)              # EUP transcendental

        u_new = exp_bdt * (u_ * cos_wdt - v_ * sin_wdt) + in_sum_dt
        v_new = exp_bdt * (u_ * sin_wdt + v_ * cos_wdt)
        q_new = gamma * q_ + z_
        # Spike uses the OLD u and the NEW q (exactly as in adbrf_II_update).
        z_new = (u_ - theta - q_new > 0.0).astype(jnp.float32)
        # TODO(synk): surrogate gradient of FGI_DGaussian not implemented (fwd only).

        z_out[...] = z_new
        u_out[...] = u_new
        v_out[...] = v_new
        q_out[...] = q_new


def _round_up(x, m):
    return ((x + m - 1) // m) * m


def _pick_tile(dim, pref, align):
    """Largest tile <= pref that divides `dim` (dim is a multiple of align)."""
    t = min(pref, dim)
    t -= t % align
    t = max(t, align)
    while dim % t:
        t -= align
    return t


def _pad2(a, rows, cols, dtype):
    a = a.astype(dtype)
    if a.shape == (rows, cols):
        return a
    return jnp.zeros((rows, cols), dtype).at[:a.shape[0], :a.shape[1]].set(a)


def prepare_adbrf_ii_params(weight, b_offset, dt, cos_omega_dt, sin_omega_dt,
                            gamma, mxu_dtype=jnp.bfloat16):
    """One-time preprocessing (hoist out of any timestep scan).

    weight: [input_size, layer_size]  (transposed vs torch nn.Linear.weight)
    Returns:
      w_dt:   [input_size, layer_size] mxu_dtype, columns pre-scaled by dt
      params: [8, layer_size] f32 slab (rows: cos, sin, gamma, b0*dt, dt)
    """
    f32 = jnp.float32
    _, L = weight.shape
    dt1 = dt.astype(f32).reshape(L)
    # Fold per-neuron dt into the weight columns -> MXU emits in_sum*dt.
    w_dt = (weight.astype(f32) * dt1[None, :]).astype(mxu_dtype)
    b0dt = -jnp.abs(b_offset.astype(f32)) * dt1
    params = jnp.zeros((8, L), f32)
    params = params.at[_ROW_COS].set(cos_omega_dt.astype(f32))
    params = params.at[_ROW_SIN].set(sin_omega_dt.astype(f32))
    params = params.at[_ROW_GAMMA].set(gamma.astype(f32))
    params = params.at[_ROW_B0DT].set(b0dt)
    params = params.at[_ROW_DT].set(dt1)
    return w_dt, params


def adbrf_ii_cell_step(x, state, w_dt, params, theta=DEFAULT_RF_THETA,
                       tb=None, tl=None, max_k=2048, interpret=False):
    """One AdBRFIICell timestep. `w_dt`/`params` come from prepare_adbrf_ii_params.

    x:      [B, input_size]
    state:  (z, u, v, q) each [B, layer_size]
    returns (z, u, v, q) each [B, layer_size] float32
    """
    z_, u_, v_, q_ = state
    B, I = x.shape
    _, L = w_dt.shape
    f32 = jnp.float32
    mxu_dtype = w_dt.dtype

    # --- padding / tiling -------------------------------------------------
    b_align = 16 if jnp.dtype(mxu_dtype).itemsize < 4 else 8
    if tb is None:
        B_pad = _round_up(max(B, b_align), b_align)
        tb = _pick_tile(B_pad, 256, b_align)
    else:
        B_pad = _round_up(max(B, tb), tb)
    if tl is None:
        L_pad = _round_up(max(L, 128), 128)
        # Prefer >= 2 L-tiles so the v7x megacore has a parallel axis to split.
        pref = 512 if L_pad >= 1024 else max(128, L_pad // 2)
        tl = _pick_tile(L_pad, pref, 128)
    else:
        L_pad = _round_up(max(L, tl), tl)

    # K-tile input_size only when it is large (keeps v7x's 64 MiB VMEM happy).
    if I > max_k:
        tk = max(128, (max_k // 128) * 128)
        I_pad = _round_up(I, tk)
    else:
        tk = I
        I_pad = I
    nk = I_pad // tk
    nb = B_pad // tb
    nl = L_pad // tl

    # --- pad operands (zeros in padded rows/cols are harmless) -------------
    x_p = _pad2(x, B_pad, I_pad, mxu_dtype)
    w_p = _pad2(w_dt, I_pad, L_pad, mxu_dtype)
    z_p = _pad2(z_, B_pad, L_pad, f32)
    u_p = _pad2(u_, B_pad, L_pad, f32)
    v_p = _pad2(v_, B_pad, L_pad, f32)
    q_p = _pad2(q_, B_pad, L_pad, f32)
    p_p = _pad2(params, 8, L_pad, f32)

    # --- grid ordering: keep the larger of {W, x} resident across the inner
    # axis (W block index must not depend on the fastest non-K axis). --------
    if L_pad >= B_pad:                       # W (I*L) >= x (B*I): L outermost
        grid = (nl, nb, nk)
        st_map = lambda lj, bi, k: (bi, lj)
        x_map = lambda lj, bi, k: (bi, k)
        w_map = lambda lj, bi, k: (k, lj)
        p_map = lambda lj, bi, k: (0, lj)
    else:                                    # x is larger: B outermost
        grid = (nb, nl, nk)
        st_map = lambda bi, lj, k: (bi, lj)
        x_map = lambda bi, lj, k: (bi, k)
        w_map = lambda bi, lj, k: (k, lj)
        p_map = lambda bi, lj, k: (0, lj)

    state_spec = pl.BlockSpec((tb, tl), st_map)
    in_specs = [
        pl.BlockSpec((tb, tk), x_map),       # x            (mxu_dtype)
        pl.BlockSpec((tk, tl), w_map),       # W * dt       (mxu_dtype)
        state_spec,                          # z_
        state_spec,                          # u_
        state_spec,                          # v_
        state_spec,                          # q_
        pl.BlockSpec((8, tl), p_map),        # stacked per-neuron params
    ]
    out_specs = (state_spec, state_spec, state_spec, state_spec)
    out_sds = jax.ShapeDtypeStruct((B_pad, L_pad), f32)

    itemsize = jnp.dtype(mxu_dtype).itemsize
    cost = pl.CostEstimate(
        flops=2 * B_pad * I_pad * L_pad + 12 * B_pad * L_pad,
        transcendentals=B_pad * L_pad,
        bytes_accessed=(B_pad * I_pad * itemsize + I_pad * L_pad * itemsize
                        + 8 * B_pad * L_pad * 4 + 8 * L_pad * 4),
    )

    kernel = functools.partial(_adbrf_ii_kernel, theta=float(theta))

    z, u, v, q = pl.pallas_call(
        kernel,
        out_shape=(out_sds, out_sds, out_sds, out_sds),
        grid_spec=pltpu.PrefetchScalarGridSpec(
            num_scalar_prefetch=0,
            grid=grid,
            in_specs=in_specs,
            out_specs=out_specs,
            scratch_shapes=[pltpu.VMEM((tb, tl), jnp.float32)],
        ),
        compiler_params=pltpu.CompilerParams(
            dimension_semantics=("parallel", "parallel", "arbitrary"),
            vmem_limit_bytes=48 * 1024 * 1024,
        ),
        # State is read-modify-write: alias (z,u,v,q) inputs onto the outputs.
        input_output_aliases={2: 0, 3: 1, 4: 2, 5: 3},
        cost_estimate=cost,
        interpret=interpret,
    )(x_p, w_p, z_p, u_p, v_p, q_p, p_p)

    if (B_pad, L_pad) != (B, L):
        z, u, v, q = z[:B, :L], u[:B, :L], v[:B, :L], q[:B, :L]
    return z, u, v, q


def adbrf_ii_cell_forward(x, cos_omega_dt, sin_omega_dt, gamma, state,
                          weight, b_offset, dt, theta=DEFAULT_RF_THETA,
                          mxu_dtype=jnp.bfloat16, **kw):
    """Convenience wrapper matching AdBRFIICell.forward (one-shot use).
    For a timestep scan, call prepare_adbrf_ii_params once and reuse."""
    w_dt, params = prepare_adbrf_ii_params(weight, b_offset, dt, cos_omega_dt,
                                           sin_omega_dt, gamma, mxu_dtype)
    return adbrf_ii_cell_step(x, state, w_dt, params, theta=theta, **kw)


# ----------------------------- reference / demo -----------------------------

def _adbrf_ii_reference(x, state, weight, b_offset, dt, cos_wdt, sin_wdt,
                        gamma, theta=DEFAULT_RF_THETA):
    z_, u_, v_, q_ = state
    in_sum = jnp.dot(x, weight, precision=jax.lax.Precision.HIGHEST)
    b0 = -jnp.abs(b_offset)[None, :]
    exp_bdt = jnp.exp((b0 - q_) * dt[None, :])
    u = exp_bdt * (u_ * cos_wdt[None, :] - v_ * sin_wdt[None, :]) + in_sum * dt[None, :]
    v = exp_bdt * (u_ * sin_wdt[None, :] + v_ * cos_wdt[None, :])
    q = gamma[None, :] * q_ + z_
    z = (u_ - theta - q > 0.0).astype(jnp.float32)
    return z, u, v, q


def _make_case(key, B, I, L, dt_scalar=DEFAULT_DT):
    ks = jax.random.split(key, 7)
    x = jax.random.normal(ks[0], (B, I), dtype=jnp.float32)
    limit = (6.0 / (I + L)) ** 0.5
    weight = jax.random.uniform(ks[1], (I, L), jnp.float32, -limit, limit)
    omega = jnp.fft.fftfreq(2 * L, d=dt_scalar)[:L].astype(jnp.float32)
    dt = dt_scalar * jnp.ones((L,), jnp.float32)
    b_offset = jax.random.uniform(ks[2], (L,), jnp.float32,
                                  DEFAULT_RF_ADAPTIVE_B_offset_a,
                                  DEFAULT_RF_ADAPTIVE_B_offset_b)
    gamma = DEFAULT_GAMMA + 0.001 * jax.random.normal(ks[3], (L,), jnp.float32)
    cos_wdt = jnp.cos(omega * dt)
    sin_wdt = jnp.sin(omega * dt)
    z0 = jnp.zeros((B, L), jnp.float32)
    u0 = 0.1 * jax.random.normal(ks[4], (B, L), jnp.float32)
    v0 = 0.1 * jax.random.normal(ks[5], (B, L), jnp.float32)
    q0 = 0.1 * jnp.abs(jax.random.normal(ks[6], (B, L), jnp.float32))
    return x, (z0, u0, v0, q0), weight, b_offset, dt, cos_wdt, sin_wdt, gamma


def _run_case(name, key, B, I, L, mxu_dtype, max_k=2048, u_atol=2e-4):
    (x, state, weight, b_offset, dt,
     cos_wdt, sin_wdt, gamma) = _make_case(key, B, I, L)
    w_dt, params = prepare_adbrf_ii_params(weight, b_offset, dt, cos_wdt,
                                           sin_wdt, gamma, mxu_dtype=mxu_dtype)
    z, u, v, q = adbrf_ii_cell_step(x, state, w_dt, params,
                                    theta=DEFAULT_RF_THETA, max_k=max_k)
    jax.block_until_ready((z, u, v, q))
    zr, ur, vr, qr = _adbrf_ii_reference(x, state, weight, b_offset, dt,
                                         cos_wdt, sin_wdt, gamma,
                                         theta=DEFAULT_RF_THETA)
    assert jnp.array_equal(z, zr), f"{name}: z mismatch"
    assert jnp.allclose(u, ur, atol=u_atol), f"{name}: u mismatch"
    assert jnp.allclose(v, vr, atol=1e-5), f"{name}: v mismatch"
    assert jnp.allclose(q, qr, atol=1e-6), f"{name}: q mismatch"


if __name__ == "__main__":
    key = jax.random.PRNGKey(0)
    k1, k2, k3 = jax.random.split(key, 3)
    # 1) (8,128)-aligned shapes, full-f32 MXU path -> tight check.
    _run_case("f32_aligned", k1, B=8, I=128, L=256,
              mxu_dtype=jnp.float32, u_atol=2e-4)
    # 2) Unaligned shapes (padding + slicing path), bf16 MXU.
    _run_case("bf16_unaligned", k2, B=5, I=96, L=200,
              mxu_dtype=jnp.bfloat16, u_atol=1e-3)
    # 3) K-tiled input axis (nk=2, accumulator scratch path), bf16 MXU.
    _run_case("bf16_ktile", k3, B=8, I=256, L=256,
              mxu_dtype=jnp.bfloat16, max_k=128, u_atol=1e-3)
    print("KERNEL_OK")
</pallas_src>

<mosaic_0001>
module attributes {stable_mosaic.version = 11 : i64} {
  func.func @_adbrf_ii_kernel(%arg0: i32, %arg1: i32, %arg2: i32, %arg3: memref<8x128xf32, #tpu.memory_space<vmem>>, %arg4: memref<128x128xf32, #tpu.memory_space<vmem>>, %arg5: memref<8x128xf32, #tpu.memory_space<vmem>>, %arg6: memref<8x128xf32, #tpu.memory_space<vmem>>, %arg7: memref<8x128xf32, #tpu.memory_space<vmem>>, %arg8: memref<8x128xf32, #tpu.memory_space<vmem>>, %arg9: memref<8x128xf32, #tpu.memory_space<vmem>>, %arg10: memref<8x128xf32, #tpu.memory_space<vmem>>, %arg11: memref<8x128xf32, #tpu.memory_space<vmem>>, %arg12: memref<8x128xf32, #tpu.memory_space<vmem>>, %arg13: memref<8x128xf32, #tpu.memory_space<vmem>>, %arg14: memref<8x128xf32, #tpu.memory_space<vmem>>) attributes {dimension_semantics = [#tpu.dimension_semantics<parallel>, #tpu.dimension_semantics<parallel>, #tpu.dimension_semantics<arbitrary>], iteration_bounds = array<i64: 2, 1, 1>, scalar_prefetch = 0 : i64, scratch_operands = 1 : i64, tpu.core_type = #tpu.core_type<tc>, window_params = [{transform_indices = @transform_0, window_bounds = array<i64: 8, 128>}, {transform_indices = @transform_1, window_bounds = array<i64: 128, 128>}, {transform_indices = @transform_2, window_bounds = array<i64: 8, 128>}, {transform_indices = @transform_3, window_bounds = array<i64: 8, 128>}, {transform_indices = @transform_4, window_bounds = array<i64: 8, 128>}, {transform_indices = @transform_5, window_bounds = array<i64: 8, 128>}, {transform_indices = @transform_6, window_bounds = array<i64: 8, 128>}, {transform_indices = @transform_7, window_bounds = array<i64: 8, 128>}, {transform_indices = @transform_8, window_bounds = array<i64: 8, 128>}, {transform_indices = @transform_9, window_bounds = array<i64: 8, 128>}, {transform_indices = @transform_10, window_bounds = array<i64: 8, 128>}]} {
    %c0_i32 = arith.constant 0 : i32
    %0 = arith.cmpi eq, %arg2, %c0_i32 : i32
    %1 = arith.extui %0 : i1 to i32
    %c0_i32_0 = arith.constant 0 : i32
    %2 = arith.cmpi ne, %1, %c0_i32_0 : i32
    scf.if %2 {
      %cst_10 = arith.constant 0.000000e+00 : f32
      %12 = vector.broadcast %cst_10 : f32 to vector<8x128xf32>
      %c0_11 = arith.constant 0 : index
      %c0_12 = arith.constant 0 : index
      %13 = vector.load %arg14[%c0_11, %c0_12] : memref<8x128xf32, #tpu.memory_space<vmem>>, vector<8x128xf32>
      tpu.vector_store %arg14[%c0_11, %c0_12], %12 {strides = array<i32>} : memref<8x128xf32, #tpu.memory_space<vmem>>, vector<8x128xf32>,
    } else {
    }
    %c0 = arith.constant 0 : index
    %c0_1 = arith.constant 0 : index
    %3 = vector.load %arg14[%c0, %c0_1] : memref<8x128xf32, #tpu.memory_space<vmem>>, vector<8x128xf32>
    %c0_2 = arith.constant 0 : index
    %c0_3 = arith.constant 0 : index
    %4 = vector.load %arg3[%c0_2, %c0_3] : memref<8x128xf32, #tpu.memory_space<vmem>>, vector<8x128xf32>
    %c0_4 = arith.constant 0 : index
    %c0_5 = arith.constant 0 : index
    %5 = vector.load %arg4[%c0_4, %c0_5] : memref<128x128xf32, #tpu.memory_space<vmem>>, vector<128x128xf32>
    %cst = arith.constant dense<0.000000e+00> : vector<8x128xf32>
    %6 = tpu.matmul %4, %5, %cst {dimension_numbers = #tpu.dot_dimension_numbers<[1], [0], [0], [1], [0, 0, 1, 1], [], []>} : vector<8x128xf32>, vector<128x128xf32>, vector<8x128xf32> -> vector<8x128xf32>
    %7 = arith.addf %3, %6 : vector<8x128xf32>
    %c0_6 = arith.constant 0 : index
    %c0_7 = arith.constant 0 : index
    %8 = vector.load %arg14[%c0_6, %c0_7] : memref<8x128xf32, #tpu.memory_space<vmem>>, vector<8x128xf32>
    tpu.vector_store %arg14[%c0_6, %c0_7], %7 {strides = array<i32>} : memref<8x128xf32, #tpu.memory_space<vmem>>, vector<8x128xf32>,
    %c0_i32_8 = arith.constant 0 : i32
    %9 = arith.cmpi eq, %arg2, %c0_i32_8 : i32
    %10 = arith.extui %9 : i1 to i32
    %c0_i32_9 = arith.constant 0 : i32
    %11 = arith.cmpi ne, %10, %c0_i32_9 : i32
    scf.if %11 {
      %c0_10 = arith.constant 0 : index
      %c0_11 = arith.constant 0 : index
      %12 = vector.load %arg14[%c0_10, %c0_11] : memref<8x128xf32, #tpu.memory_space<vmem>>, vector<8x128xf32>
      %c0_12 = arith.constant 0 : index
      %c0_13 = arith.constant 0 : index
      %13 = vector.load %arg6[%c0_12, %c0_13] : memref<8x128xf32, #tpu.memory_space<vmem>>, vector<8x128xf32>
      %c0_14 = arith.constant 0 : index
      %c0_15 = arith.constant 0 : index
      %14 = vector.load %arg7[%c0_14, %c0_15] : memref<8x128xf32, #tpu.memory_space<vmem>>, vector<8x128xf32>
      %c0_16 = arith.constant 0 : index
      %c0_17 = arith.constant 0 : index
      %15 = vector.load %arg8[%c0_16, %c0_17] : memref<8x128xf32, #tpu.memory_space<vmem>>, vector<8x128xf32>
      %c0_18 = arith.constant 0 : index
      %c0_19 = arith.constant 0 : index
      %16 = vector.load %arg5[%c0_18, %c0_19] : memref<8x128xf32, #tpu.memory_space<vmem>>, vector<8x128xf32>
      %c0_20 = arith.constant 0 : index
      %c0_21 = arith.constant 0 : index
      %17 = vector.load %arg9[%c0_20, %c0_21] : memref<8x128xf32, #tpu.memory_space<vmem>>, vector<8x128xf32>
      %18 = vector.extract_strided_slice %17 {offsets = [0, 0], sizes = [1, 128], strides = [1, 1]} : vector<8x128xf32> to vector<1x128xf32>
      %19 = vector.extract_strided_slice %17 {offsets = [1, 0], sizes = [1, 128], strides = [1, 1]} : vector<8x128xf32> to vector<1x128xf32>
      %20 = vector.extract_strided_slice %17 {offsets = [2, 0], sizes = [1, 128], strides = [1, 1]} : vector<8x128xf32> to vector<1x128xf32>
      %21 = vector.extract_strided_slice %17 {offsets = [3, 0], sizes = [1, 128], strides = [1, 1]} : vector<8x128xf32> to vector<1x128xf32>
      %22 = vector.extract_strided_slice %17 {offsets = [4, 0], sizes = [1, 128], strides = [1, 1]} : vector<8x128xf32> to vector<1x128xf32>
      %23 = vector.broadcast %22 : vector<1x128xf32> to vector<8x128xf32>
      %24 = arith.mulf %15, %23 : vector<8x128xf32>
      %25 = vector.broadcast %21 : vector<1x128xf32> to vector<8x128xf32>
      %26 = arith.subf %25, %24 : vector<8x128xf32>
      %27 = math.exp %26 : vector<8x128xf32>
      %28 = vector.broadcast %18 : vector<1x128xf32> to vector<8x128xf32>
      %29 = arith.mulf %13, %28 : vector<8x128xf32>
      %30 = vector.broadcast %19 : vector<1x128xf32> to vector<8x128xf32>
      %31 = arith.mulf %14, %30 : vector<8x128xf32>
      %32 = arith.subf %29, %31 : vector<8x128xf32>
      %33 = arith.mulf %27, %32 : vector<8x128xf32>
      %34 = arith.addf %33, %12 : vector<8x128xf32>
      %35 = vector.broadcast %19 : vector<1x128xf32> to vector<8x128xf32>
      %36 = arith.mulf %13, %35 : vector<8x128xf32>
      %37 = vector.broadcast %18 : vector<1x128xf32> to vector<8x128xf32>
      %38 = arith.mulf %14, %37 : vector<8x128xf32>
      %39 = arith.addf %36, %38 : vector<8x128xf32>
      %40 = arith.mulf %27, %39 : vector<8x128xf32>
      %41 = vector.broadcast %20 : vector<1x128xf32> to vector<8x128xf32>
      %42 = arith.mulf %41, %15 : vector<8x128xf32>
      %43 = arith.addf %42, %16 : vector<8x128xf32>
      %cst_22 = arith.constant 1.000000e-01 : f32
      %44 = vector.broadcast %cst_22 : f32 to vector<8x128xf32>
      %45 = arith.subf %13, %44 : vector<8x128xf32>
      %46 = arith.subf %45, %43 : vector<8x128xf32>
      %cst_23 = arith.constant 0.000000e+00 : f32
      %47 = vector.broadcast %cst_23 : f32 to vector<8x128xf32>
      %48 = arith.cmpf ogt, %46, %47 : vector<8x128xf32>
      %49 = arith.extui %48 : vector<8x128xi1> to vector<8x128xi32>
      %50 = arith.sitofp %49 : vector<8x128xi32> to vector<8x128xf32>
      %c0_24 = arith.constant 0 : index
      %c0_25 = arith.constant 0 : index
      %51 = vector.load %arg10[%c0_24, %c0_25] : memref<8x128xf32, #tpu.memory_space<vmem>>, vector<8x128xf32>
      tpu.vector_store %arg10[%c0_24, %c0_25], %50 {strides = array<i32>} : memref<8x128xf32, #tpu.memory_space<vmem>>, vector<8x128xf32>,
      %c0_26 = arith.constant 0 : index
      %c0_27 = arith.constant 0 : index
      %52 = vector.load %arg11[%c0_26, %c0_27] : memref<8x128xf32, #tpu.memory_space<vmem>>, vector<8x128xf32>
      tpu.vector_store %arg11[%c0_26, %c0_27], %34 {strides = array<i32>} : memref<8x128xf32, #tpu.memory_space<vmem>>, vector<8x128xf32>,
      %c0_28 = arith.constant 0 : index
      %c0_29 = arith.constant 0 : index
      %53 = vector.load %arg12[%c0_28, %c0_29] : memref<8x128xf32, #tpu.memory_space<vmem>>, vector<8x128xf32>
      tpu.vector_store %arg12[%c0_28, %c0_29], %40 {strides = array<i32>} : memref<8x128xf32, #tpu.memory_space<vmem>>, vector<8x128xf32>,
      %c0_30 = arith.constant 0 : index
      %c0_31 = arith.constant 0 : index
      %54 = vector.load %arg13[%c0_30, %c0_31] : memref<8x128xf32, #tpu.memory_space<vmem>>, vector<8x128xf32>
      tpu.vector_store %arg13[%c0_30, %c0_31], %43 {strides = array<i32>} : memref<8x128xf32, #tpu.memory_space<vmem>>, vector<8x128xf32>,
    } else {
    }
    return
  }
  func.func @transform_0(%arg0: i32, %arg1: i32, %arg2: i32) -> (i32, i32) {
    %c0_i32 = arith.constant 0 : i32
    return %arg1, %arg2 : i32, i32
  }
  func.func @transform_1(%arg0: i32, %arg1: i32, %arg2: i32) -> (i32, i32) {
    %c0_i32 = arith.constant 0 : i32
    return %arg2, %arg0 : i32, i32
  }
  func.func @transform_2(%arg0: i32, %arg1: i32, %arg2: i32) -> (i32, i32) {
    %c0_i32 = arith.constant 0 : i32
    return %arg1, %arg0 : i32, i32
  }
  func.func @transform_3(%arg0: i32, %arg1: i32, %arg2: i32) -> (i32, i32) {
    %c0_i32 = arith.constant 0 : i32
    return %arg1, %arg0 : i32, i32
  }
  func.func @transform_4(%arg0: i32, %arg1: i32, %arg2: i32) -> (i32, i32) {
    %c0_i32 = arith.constant 0 : i32
    return %arg1, %arg0 : i32, i32
  }
  func.func @transform_5(%arg0: i32, %arg1: i32, %arg2: i32) -> (i32, i32) {
    %c0_i32 = arith.constant 0 : i32
    return %arg1, %arg0 : i32, i32
  }
  func.func @transform_6(%arg0: i32, %arg1: i32, %arg2: i32) -> (i32, i32) {
    %c0_i32 = arith.constant 0 : i32
    %c0_i32_0 = arith.constant 0 : i32
    return %c0_i32, %arg0 : i32, i32
  }
  func.func @transform_7(%arg0: i32, %arg1: i32, %arg2: i32) -> (i32, i32) {
    %c0_i32 = arith.constant 0 : i32
    return %arg1, %arg0 : i32, i32
  }
  func.func @transform_8(%arg0: i32, %arg1: i32, %arg2: i32) -> (i32, i32) {
    %c0_i32 = arith.constant 0 : i32
    return %arg1, %arg0 : i32, i32
  }
  func.func @transform_9(%arg0: i32, %arg1: i32, %arg2: i32) -> (i32, i32) {
    %c0_i32 = arith.constant 0 : i32
    return %arg1, %arg0 : i32, i32
  }
  func.func @transform_10(%arg0: i32, %arg1: i32, %arg2: i32) -> (i32, i32) {
    %c0_i32 = arith.constant 0 : i32
    return %arg1, %arg0 : i32, i32
  }
}

</mosaic_0001>

<bundles_post_ra>
// kernel: tpu_custom_call.1
= control target key start
LH: loop header
LB: loop body
LE: loop exit
PB: predicated region body
PF: predicated region fallthrough
CT: control target
= control target key end

     0   :  { %s2281_s0 = inlined_call_operand.vmem [shape: f32[8,128], index: 0, kind: input, shape index: {}]   ;;  %s2282_s1 = inlined_call_operand.hbm [shape: f32[128,256], index: 1, kind: input, shape index: {}]   ;;  %s2283_s2 = inlined_call_operand.hbm [shape: f32[8,256], index: 2, kind: input, shape index: {}, may-alias: {2,7}]   ;;  %s2284_s3 = inlined_call_operand.hbm [shape: f32[8,256], index: 3, kind: input, shape index: {}, may-alias: {3,8}]   ;;  %s2285_s4 = inlined_call_operand.hbm [shape: f32[8,256], index: 4, kind: input, shape index: {}, may-alias: {4,9}]   ;;  %s2286_s5 = inlined_call_operand.hbm [shape: f32[8,256], index: 5, kind: input, shape index: {}, may-alias: {5,10}]   ;;  %s2287_s6 = inlined_call_operand.vmem [shape: f32[8,256], index: 6, kind: input, shape index: {}]   ;;  %s2288_s7 = inlined_call_operand.hbm [shape: f32[8,256], index: 7, kind: output, shape index: {0}, may-alias: {2,7}]   ;;  %s2289_s8 = inlined_call_operand.hbm [shape: f32[8,256], index: 8, kind: output, shape index: {1}, may-alias: {3,8}]   ;;  %s2290_s9 = inlined_call_operand.hbm [shape: f32[8,256], index: 9, kind: output, shape index: {2}, may-alias: {4,9}]   ;;  %s2291_s10 = inlined_call_operand.hbm [shape: f32[8,256], index: 10, kind: output, shape index: {3}, may-alias: {5,10}]  }
   0x1   :  { %2308 = sst [smem:[#allocation31_spill]] %s2282_s1 }
   0x2   :  { %2309 = sst [smem:[#allocation32_spill]] %s2283_s2 }
   0x3   :  { %2310 = sst [smem:[#allocation33_spill]] %s2285_s4 }
   0x4   :  { %2311 = sst [smem:[#allocation34_spill]] %s2289_s8 }
   0x5   :  { %2312 = sst [smem:[#allocation35_spill]] %s2290_s9 }
   0x6   :  { %2313 = sst [smem:[#allocation36_spill]] %s2291_s10 }
   0x7   :  { %16 = vsyncpa [#allocation4], 0 }
   0x8   :  { %18 = vsyncpa [#allocation4 + $0x1], 0 }
   0x9   :  { %19 = vsyncpa [#allocation7], 0 }
   0xa   :  { %21 = vsyncpa [#allocation7 + $0x1], 0 }
   0xb   :  { %22 = vsyncpa [#allocation10], 0 }
   0xc   :  { %24 = vsyncpa [#allocation10 + $0x1], 0 }
   0xd   :  { %25 = vsyncpa [#allocation5], 0 }
   0xe   :  { %27 = vsyncpa [#allocation5 + $0x1], 0 }
   0xf   :  { %28 = vsyncpa [#allocation14], 0 }
  0x10   :  { %30 = vsyncpa [#allocation14 + $0x1], 0 }
  0x11   :  { %31 = vsyncpa [#allocation17], 0 }
  0x12   :  { %33 = vsyncpa [#allocation17 + $0x1], 0  ;;  %s1796_s13 = smov 0   ;;  %s1798_s14 = smov 0  }
  0x13   :  { %s1800_s15 = smov 0   ;;  %s1802_s16 = smov 0  }
  0x14   :  { %s1804_s17 = smov 0   ;;  %s1806_s18 = smov 0  }
  0x15 LB: > { %2314 = sst [smem:[#allocation24_spill]] %s1704_s13  ;;  %s1827_s19 = sadd.s32 4294967295, %s1724_s18   ;;  %s1724_s18 = sphi %s1806_s18, %s39_s18   ;;  %s1720_s17 = sphi %s1804_s17, %s2354_s17   ;;  %s1716_s16 = sphi %s1802_s16, %s2353_s16   ;;  %s1712_s15 = sphi %s1800_s15, %s2352_s15   ;;  %s1708_s14 = sphi %s1798_s14, %s2356_s14   ;;  %s1704_s13 = sphi %s1796_s13, %s2355_s13  }
  0x16   : > { %2315 = sst [smem:[#allocation25_spill]] %s1712_s15  ;;  %s2292_s20 = sadd.s32 4294967294, %s1724_s18  }
  0x17   : > { %2316 = sst [smem:[#allocation26_spill]] %s1720_s17  ;;  %s58_s21 = sadd.s32 1, %s1720_s17 }
  0x18   : > { %2317 = sst [smem:[#allocation27_spill]] %s1724_s18  ;;  %s95_s22 = sadd.s32 1, %s1712_s15 }
  0x19   : > { %p60_p0 = scmp.ge.s32.totalorder %s58_s21, 2  ;;  %p102_p1 = scmp.ne.s32.totalorder %s1712_s15, %s1708_s14 }
  0x1a   : > { %p103_p2 = scmp.eq.s32.totalorder %s1724_s18, 0  ;;  %p108_p3 = scmp.ne.s32.totalorder %s1708_s14, %s1704_s13 }
  0x1b   : > { %s2358_s21 = smov (%p60_p0, %s58_s21), 0  ;;  %p109_p5 = scmp.eq.s32.totalorder %s1827_s19, 0 }
  0x1c   : > { %2318 = sst [smem:[#allocation28_spill]] %s2358_s21  ;;  %p1839_p4 = por %p103_p2, %p102_p1 }
  0x1d   : > { %s91_s24 = ssub.s32 %s1720_s17, %s2358_s21  ;;  %p272_p6 = scmp.eq.s32.totalorder %s1827_s19, 1 }
  0x1e   : > { %p93_p7 = scmp.eq.s32.totalorder %s91_s24, 0  ;;  %p1847_p8 = por %p109_p5, %p108_p3 }
  0x1f   : > { %p1851_p9 = por %p272_p6, %p102_p1  ;;  %p278_p10 = scmp.eq.s32.totalorder %s2292_s20, 1 }
  0x20   : > { %s2320_s25 = scalar_select %p1847_p8, 1, 0 }
  0x21   : > { %s2321_s26 = scalar_select %p1851_p9, 1, 0 }
  0x22   : > { %s1858_s27 = scalar_select %p93_p7, %s1712_s15, %s95_s22  }
  0x23   : > { %p1860_p11 = por %p278_p10, %p108_p3  ;;  %p1334_p13 = scmp.lt.s32.totalorder %s1724_s18, 2 }
  0x24   : > { %2322 = sst [smem:[#allocation29_spill]] %s1858_s27  ;;  %s1867_s29 = sand.u32 1, %s1712_s15  }
  0x25   : > { %s2323_s28 = scalar_select %p1860_p11, 1, 0 }
  0x26   : > { %s1870_s30 = sshll.u32 %s1720_s17, 7  ;;  %p1875_p0 = pnand %p1334_p13, %p1839_p4 }
  0x27   : > { %2324 = sst [smem:[#allocation30_spill]] %s2323_s28  ;;  %s1880_s22 = sshll.u32 %s1867_s29, 3 }
  0x28   : > { %s2325_s12 = scalar_select %p1875_p0, 1, 0 }
  0x29   : > { %s2326_s2 = sld [smem:[#allocation32_spill]]  ;;  %s419_s17 = scalar_lea.vmem [#allocation6], %s1880_s22 }
  0x2a   : > { %s428_s11 = sshll.u32 %s419_s17, 4  ;;  %s2327_s23 = sand.u32 1, %s1724_s18   ;;  %s1890_s11 = int_to_ptr.vmem [resolvable:$true] %s428_s11 }
  0x2b   : > { %s1895_s27 = scalar_lea.sflag [#allocation7], %s2327_s23  ;;  %p1901_p4 = pneg %p1875_p0 }
  0x2f   : > { %s1886_s21 = scalar_lea.hbm %s2326_s2, %s1870_s30  ;;  %s1397_s28 = scalar_lea.hbm %s2326_s2, 256 }
  0x30   : > { %s1392_s15 = scalar_lea.hbm %s1886_s21, 128  ;;  %p1398_p7 = scmp.lt.u32.totalorder %s1886_s21, %s2326_s2 }
  0x31   : > { %p1393_p3 = scmp.ne.s32.totalorder %s1886_s21, %s1392_s15  ;;  %p1399_p10 = scmp.lt.u32.totalorder %s1397_s28, %s1392_s15 }
  0x32   : > { %p1401_p12 = scmp.lt.u32.totalorder %s1392_s15, %s1886_s21 }
  0x33   : > { %p1395_p5 = pnand %p1901_p4, %p1393_p3  ;;  %p1400_p13 = por %p1399_p10, %p1398_p7 }
  0x35   : > { %p1396_p6 = pneg %p1395_p5  ;;  %p1402_p1 = por %p1401_p12, %p1400_p13 }
  0x37   : > { %p1403_p2 = pnand %p1402_p1, %p1396_p6 }
  0x39   : > { %1406 = shalt.err (!%p1403_p2)
}
  0x3a   : > { %s1407_s23 = scalar_lea.vmem %s1890_s11, 128  ;;  %s1726_s24 = smov [#allocation6]  }
  0x3b   : > { %p1408_p3 = scmp.ne.s32.totalorder %s1890_s11, %s1407_s23  ;;  %s1412_s17 = sshll.u32 %s1726_s24, 4  ;;  %s1413_s17 = int_to_ptr.vmem [resolvable:$false] %s1412_s17 }
  0x3c   : > { %s1414_s9 = scalar_lea.vmem %s1413_s17, 256  ;;  %p1415_p9 = scmp.lt.s32.totalorder %s1890_s11, %s1413_s17 }
  0x3d   : > { %p1410_p5 = pnand %p1408_p3, %p1901_p4  ;;  %p1416_p8 = scmp.lt.s32.totalorder %s1414_s9, %s1407_s23 }
  0x3f   : > { %p1411_p11 = pneg %p1410_p5  ;;  %p1417_p7 = por %p1416_p8, %p1415_p9 }
  0x41   : > { %p1418_p10 = pnand %p1417_p7, %p1411_p11 }
  0x43   : > { %1421 = shalt.err (!%p1418_p10)
}
  0x44   : > { %1311 = dma.hbm_to_vmem [thread:$0]  (!%p1875_p0), %s1886_s21, 128, %s1890_s11, %s1895_s27  }
  0x45   : > { %p2329_p12 = scmp.lt.s32.totalorder %s1724_s18, 3  ;;  %p2330_p1 = scmp.ge.s32.totalorder %s1724_s18, 1 }
  0x46   : > { %s2332_s4 = sld [smem:[#allocation33_spill]]  ;;  %s459_s24 = scalar_lea.vmem [#allocation9], %s1880_s22 }
  0x47   : > { %p1929_p2 = pnand %p2330_p1, %p2329_p12  ;;  %s468_s17 = sshll.u32 %s459_s24, 4  ;;  %s469_s17 = int_to_ptr.vmem [resolvable:$true] %s468_s17 }
  0x48   : > { %s2333_s9 = sand.u32 1, %s1724_s18  }
  0x49   : > { %s2331_s13 = scalar_select %p1929_p2, 1, 0 }
  0x4a   : > { %s1942_s21 = scalar_lea.sflag [#allocation10], %s2333_s9 }
  0x4c   : > { %s1937_s23 = scalar_lea.hbm %s2332_s4, %s1870_s30  ;;  %s1427_s15 = scalar_lea.hbm %s2332_s4, 256 }
  0x4d   : > { %s1422_s11 = scalar_lea.hbm %s1937_s23, 128  ;;  %p1428_p6 = scmp.lt.u32.totalorder %s1937_s23, %s2332_s4 }
  0x4e   : > { %p1423_p8 = scmp.ne.s32.totalorder %s1937_s23, %s1422_s11  ;;  %p1429_p13 = scmp.lt.u32.totalorder %s1427_s15, %s1422_s11 }
  0x4f   : > { %p1431_p5 = scmp.lt.u32.totalorder %s1422_s11, %s1937_s23 }
  0x50   : > { %p1425_p9 = pnand %p1423_p8, %p1901_p4  ;;  %p1430_p3 = por %p1429_p13, %p1428_p6 }
  0x52   : > { %p1426_p11 = pneg %p1425_p9  ;;  %p1432_p7 = por %p1431_p5, %p1430_p3 }
  0x54   : > { %p1433_p10 = pnand %p1432_p7, %p1426_p11 }
  0x56   : > { %1436 = shalt.err (!%p1433_p10)
}
  0x57   : > { %s1437_s24 = scalar_lea.vmem %s469_s17, 128  ;;  %s1727_s9 = smov [#allocation9]  }
  0x58   : > { %p1438_p12 = scmp.ne.s32.totalorder %s469_s17, %s1437_s24  ;;  %s1442_s18 = sshll.u32 %s1727_s9, 4  ;;  %s1443_s18 = int_to_ptr.vmem [resolvable:$false] %s1442_s18 }
  0x59   : > { %s1444_s2 = scalar_lea.vmem %s1443_s18, 256  ;;  %p1445_p9 = scmp.lt.s32.totalorder %s469_s17, %s1443_s18 }
  0x5a   : > { %p1440_p1 = pnand %p1438_p12, %p1901_p4  ;;  %p1446_p2 = scmp.lt.s32.totalorder %s1444_s2, %s1437_s24 }
  0x5c   : > { %p1441_p8 = pneg %p1440_p1  ;;  %p1447_p0 = por %p1446_p2, %p1445_p9 }
  0x5e   : > { %p1448_p6 = pnand %p1447_p0, %p1441_p8 }
  0x60   : > { %1451 = shalt.err (!%p1448_p6)
}
  0x61   : > { %p2334_p13 = scmp.ne.s32.totalorder %s2325_s12, 0  ;;  %s1178_s8 = sshll.u32 %s1867_s29, 7 }
  0x62   : > { %s2335_s1 = sld [smem:[#allocation31_spill]]  ;;  %s396_s18 = scalar_lea.vmem [#allocation3], %s1178_s8 }
  0x63   : > { %1317 = dma.hbm_to_vmem [thread:$0]  (!%p2334_p13), %s1937_s23, 128, %s469_s17, %s1942_s21  }
  0x64   : > { %s405_s28 = sshll.u32 %s396_s18, 4  ;;  %s393_s24 = scalar_lea.sflag [#allocation4], %s1867_s29  ;;  %s1969_s28 = int_to_ptr.vmem [resolvable:$true] %s405_s28 }
  0x68   : > { %s1967_s15 = scalar_lea.hbm %s2335_s1, %s1870_s30  ;;  %s1457_s2 = scalar_lea.hbm %s2335_s1, 4096 }
  0x69   : > { %s1452_s9 = scalar_lea.hbm %s1967_s15, 2048  ;;  %p1458_p3 = scmp.lt.u32.totalorder %s1967_s15, %s2335_s1 }
  0x6a   : > { %p1453_p0 = scmp.ne.s32.totalorder %s1967_s15, %s1452_s9  ;;  %p1459_p5 = scmp.lt.u32.totalorder %s1457_s2, %s1452_s9 }
  0x6b   : > { %p1461_p10 = scmp.lt.u32.totalorder %s1452_s9, %s1967_s15 }
  0x6c   : > { %p1455_p2 = pnand %p1453_p0, %p1901_p4  ;;  %p1460_p7 = por %p1459_p5, %p1458_p3 }
  0x6e   : > { %p1456_p11 = pneg %p1455_p2  ;;  %p1462_p12 = por %p1461_p10, %p1460_p7 }
  0x70   : > { %p1463_p1 = pnand %p1462_p12, %p1456_p11 }
  0x72   : > { %1466 = shalt.err (!%p1463_p1)
}
  0x73   : > { %s1467_s8 = scalar_lea.vmem %s1969_s28, 2048  ;;  %s1728_s18 = smov [#allocation3]  }
  0x74   : > { %p1468_p8 = scmp.ne.s32.totalorder %s1969_s28, %s1467_s8  ;;  %s1472_s23 = sshll.u32 %s1728_s18, 4  ;;  %s1473_s23 = int_to_ptr.vmem [resolvable:$false] %s1472_s23 }
  0x75   : > { %s1474_s17 = scalar_lea.vmem %s1473_s23, 4096  ;;  %p1475_p0 = scmp.lt.s32.totalorder %s1969_s28, %s1473_s23 }
  0x76   : > { %p1470_p9 = pnand %p1468_p8, %p1901_p4  ;;  %p1476_p2 = scmp.lt.s32.totalorder %s1474_s17, %s1467_s8 }
  0x78   : > { %p1471_p6 = pneg %p1470_p9  ;;  %p1477_p3 = por %p1476_p2, %p1475_p0 }
  0x7a   : > { %p1478_p5 = pnand %p1477_p3, %p1471_p6 }
  0x7c   : > { %1481 = shalt.err (!%p1478_p5)
}
  0x7d   : > { %s1729_s9 = smov 256   ;;  %s1730_s2 = smov 128  }
  0x7e   : > { %s1731_s10 = smov 8   ;;  %s1999_s8 = scalar_lea.hbm %s2284_s3, %s1870_s30 }
  0x7f   : > { %1308 = dma.hbm_to_vmem [thread:$0]  (!%p2334_p13), %s1967_s15, 2048, %s1969_s28, %s393_s24, %s1729_s9, %s1730_s2, %s1731_s10  }
  0x80   : > { %s439_s23 = scalar_lea.vmem [#allocation8], %s1880_s22  ;;  %s1482_s1 = scalar_lea.hbm %s1999_s8, 128 }
  0x81   : > { %s448_s17 = sshll.u32 %s439_s23, 4  ;;  %p1483_p11 = scmp.ne.s32.totalorder %s1999_s8, %s1482_s1  ;;  %s449_s17 = int_to_ptr.vmem [resolvable:$true] %s448_s17 }
  0x82   : > { %s1487_s15 = scalar_lea.hbm %s2284_s3, 256  ;;  %p1488_p12 = scmp.lt.u32.totalorder %s1999_s8, %s2284_s3 }
  0x83   : > { %p1485_p7 = pnand %p1483_p11, %p1901_p4  ;;  %p1489_p1 = scmp.lt.u32.totalorder %s1487_s15, %s1482_s1 }
  0x84   : > { %p1491_p9 = scmp.lt.u32.totalorder %s1482_s1, %s1999_s8 }
  0x85   : > { %p1486_p10 = pneg %p1485_p7  ;;  %p1490_p8 = por %p1489_p1, %p1488_p12 }
  0x87   : > { %p1492_p6 = por %p1491_p9, %p1490_p8 }
  0x89   : > { %p1493_p0 = pnand %p1492_p6, %p1486_p10 }
  0x8b   : > { %1496 = shalt.err (!%p1493_p0)
}
  0x8c   : > { %s1497_s9 = scalar_lea.vmem %s449_s17, 128  ;;  %s1732_s2 = smov [#allocation8]  }
  0x8d   : > { %p1498_p2 = scmp.ne.s32.totalorder %s449_s17, %s1497_s9  ;;  %s1502_s10 = sshll.u32 %s1732_s2, 4  ;;  %s1503_s10 = int_to_ptr.vmem [resolvable:$false] %s1502_s10 }
  0x8e   : > { %s1504_s4 = scalar_lea.vmem %s1503_s10, 256  ;;  %p1505_p11 = scmp.lt.s32.totalorder %s449_s17, %s1503_s10 }
  0x8f   : > { %p1500_p3 = pnand %p1498_p2, %p1901_p4  ;;  %p1506_p7 = scmp.lt.s32.totalorder %s1504_s4, %s1497_s9 }
  0x91   : > { %p1501_p5 = pneg %p1500_p3  ;;  %p1507_p13 = por %p1506_p7, %p1505_p11 }
  0x93   : > { %p1508_p1 = pnand %p1507_p13, %p1501_p5 }
  0x95   : > { %1511 = shalt.err (!%p1508_p1)
}
  0x96   : > { %p2336_p12 = scmp.ne.s32.totalorder %s2325_s12, 0  ;;  %s2024_s18 = scalar_lea.hbm %s2286_s5, %s1870_s30 }
  0x97   : > { %s479_s23 = scalar_lea.vmem [#allocation11], %s1880_s22  ;;  %s1512_s15 = scalar_lea.hbm %s2024_s18, 128 }
  0x98   : > { %1314 = dma.hbm_to_vmem [thread:$0]  (!%p2336_p12), %s1999_s8, 128, %s449_s17, %s1895_s27  }
  0x99   : > { %s488_s29 = sshll.u32 %s479_s23, 4  ;;  %p1513_p13 = scmp.ne.s32.totalorder %s2024_s18, %s1512_s15  ;;  %s489_s29 = int_to_ptr.vmem [resolvable:$true] %s488_s29 }
  0x9a   : > { %s1517_s27 = scalar_lea.hbm %s2286_s5, 256  ;;  %p1518_p9 = scmp.lt.u32.totalorder %s2024_s18, %s2286_s5 }
  0x9b   : > { %p1515_p10 = pnand %p1513_p13, %p1901_p4  ;;  %p1519_p6 = scmp.lt.u32.totalorder %s1517_s27, %s1512_s15 }
  0x9c   : > { %p1521_p2 = scmp.lt.u32.totalorder %s1512_s15, %s2024_s18 }
  0x9d   : > { %p1516_p8 = pneg %p1515_p10  ;;  %p1520_p0 = por %p1519_p6, %p1518_p9 }
  0x9f   : > { %p1522_p3 = por %p1521_p2, %p1520_p0 }
  0xa1   : > { %p1523_p5 = pnand %p1522_p3, %p1516_p8 }
  0xa3   : > { %1526 = shalt.err (!%p1523_p5)
}
  0xa4   : > { %s1527_s30 = scalar_lea.vmem %s489_s29, 128  ;;  %s1733_s22 = smov [#allocation11]  }
  0xa5   : > { %p1528_p11 = scmp.ne.s32.totalorder %s489_s29, %s1527_s30  ;;  %s1532_s9 = sshll.u32 %s1733_s22, 4  ;;  %s1533_s9 = int_to_ptr.vmem [resolvable:$false] %s1532_s9 }
  0xa6   : > { %s1534_s2 = scalar_lea.vmem %s1533_s9, 256  ;;  %p1535_p13 = scmp.lt.s32.totalorder %s489_s29, %s1533_s9 }
  0xa7   : > { %p1530_p7 = pnand %p1528_p11, %p1901_p4  ;;  %p1536_p10 = scmp.lt.s32.totalorder %s1534_s2, %s1527_s30 }
  0xa9   : > { %p1531_p1 = pneg %p1530_p7  ;;  %p1537_p12 = por %p1536_p10, %p1535_p13 }
  0xab   : > { %p1538_p6 = pnand %p1537_p12, %p1531_p1 }
  0xad   : > { %1541 = shalt.err (!%p1538_p6)
}
  0xae   : > { %p2337_p9 = scmp.ne.s32.totalorder %s2325_s12, 0  ;;  %p2338_p8 = scmp.ne.s32.totalorder %s2331_s13, 0 }
  0xaf   : > { %s2048_s20 = sand.u32 (!%p2338_p8), 1, %s1708_s14   ;;  %p2339_p4 = scmp.ne.s32.totalorder (!%p2338_p8), %s2320_s25, 0 }
  0xb0   : > { %1320 = dma.hbm_to_vmem [thread:$0]  (!%p2337_p9), %s2024_s18, 128, %s489_s29, %s1942_s21  }
  0xb1   : > { %504 = sbr.rel (%p2338_p8) target bundleno = 476 (0x1dc), region = 48  ;;  %s1189_s10 = sshll.u32 (!%p2338_p8), %s2048_s20, 7 }
  0xb2   : > { %s507_s4 = scalar_lea.sflag (!%p2338_p8), [#allocation4], %s2048_s20  ;;  %s2052_s1 = scalar_lea.vmem (!%p2338_p8), [#allocation3], %s1189_s10 }
  0xb8   : > { %1679 = dma.done.wait (%p2339_p4), %s507_s4, 2048  }
  0xb9   : > { %1681 = vsyncadd (%p2339_p4), %s507_s4, 4294965248  ;;  %s2059_s12 = sand.u32 1, %s1827_s19   ;;  %s2062_s13 = sshll.u32 %s2048_s20, 3 }
  0xba   : > { %s516_s21 = scalar_lea.sflag [#allocation7], %s2059_s12  ;;  %s519_s11 = scalar_lea.vmem [#allocation6], %s2062_s13 }
  0xbb   : > { %1683 = dma.done.wait (%p2339_p4), %s516_s21, 256  }
  0xbc   : > { %1685 = vsyncadd (%p2339_p4), %s516_s21, 4294967040  ;;  %s528_s18 = scalar_lea.vmem [#allocation8], %s2062_s13  ;;  %s534_s23 = scalar_lea.sflag [#allocation10], %s2059_s12 }
  0xbd   : > { %s537_s29 = scalar_lea.vmem [#allocation9], %s2062_s13 }
  0xbe   : > { %1687 = dma.done.wait (%p2339_p4), %s534_s23, 256  }
  0xbf   : > { %1689 = vsyncadd (%p2339_p4), %s534_s23, 4294967040  ;;  %v1734_v0 = vmov 0.0|0.0   ;;  %p637_p12 = scmp.lt.s32.totalorder %s1716_s16, 1  ;;  %vm1735_vm0 = vmmov 0   ;;  %v1736_v1 = vmov 0.0   ;;  %v745_v2 = vlaneseq  ;;  %v648_v3 = vld [vmem:[%s2052_s1] sm:$0xff] }
  0xc0   : > { %1263 = vmatprep.subr.bf16.mxu0 %v1734_v0  ;;  %1260 = vmatprep.mubr.msk.f32.mxu0 %vm1735_vm0, %v1736_v1  ;;  %v649_v4 = vld [vmem:[%s2052_s1 + $0x8] sm:$0xff]  ;;  %v650_v5 = vld [vmem:[%s2052_s1 + $0x10] sm:$0xff]  ;;  %v651_v7 = vld [vmem:[%s2052_s1 + $0x18] sm:$0xff]  ;;  %s546_s27 = scalar_lea.vmem [#allocation11], %s2062_s13  ;;  %s607_s8 = scalar_lea.vmem [#allocation12], %s2062_s13 }
  0xc1   : > { %s638_s19 = scalar_select %p637_p12, %s1716_s16, 1  ;;  %v1264_v6 = vpack.c.bf16 %v649_v4, %v648_v3  ;;  %v2084_v8 = vshrl.u32 %v745_v2, 7  ;;  %v1267_v9 = vpack.c.bf16 %v651_v7, %v650_v5  ;;  %v652_v11 = vld [vmem:[%s2052_s1 + $0x20] sm:$0xff]  ;;  %v653_v12 = vld [vmem:[%s2052_s1 + $0x28] sm:$0xff]  ;;  %v654_v15 = vld [vmem:[%s2052_s1 + $0x30] sm:$0xff] }
  0xc2   : > { %v1270_v14 = vpack.c.bf16 %v653_v12, %v652_v11  ;;  %v655_v16 = vld [vmem:[%s2052_s1 + $0x38] sm:$0xff]  ;;  %v743_v20 = vld [vmem:[%s519_s11] sm:$0xff]  ;;  %v658_v29 = vld [vmem:[%s2052_s1 + $0x50] sm:$0xff]  ;;  %s2132_s22 = sshll.u32 %s1716_s16, 7  ;;  %s820_s4 = sshll.u32 %s607_s8, 4  ;;  %s821_s4 = int_to_ptr.vmem [resolvable:$true] %s820_s4 }
  0xc3   : > { %s1198_s25 = sshll.u32 %s638_s19, 3  ;;  %1265 = vmatpush3.bf16.msra.mxu0 %v1264_v6  ;;  %v776_v10 = vsub.s32 2, %v2084_v8  ;;  %v740_v18 = vld [vmem:[%s528_s18] sm:$0xff]  ;;  %v1273_v23 = vpack.c.bf16 %v655_v16, %v654_v15  ;;  %v656_v25 = vld [vmem:[%s2052_s1 + $0x40] sm:$0xff]  ;;  %v657_v26 = vld [vmem:[%s2052_s1 + $0x48] sm:$0xff]  ;;  %v747_v40 = vsub.s32 4, %v2084_v8  ;;  %s2138_s10 = scalar_lea.hbm %s2288_s7, %s2132_s22 }
  0xc4   : > { %s640_s24 = scalar_lea.vmem %s2287_s6, %s1198_s25  ;;  %1266 = vmatprep.subr.bf16.mxu0 %v1734_v0  ;;  %v742_v19 = vld [vmem:[%s546_s27] sm:$0xff]  ;;  %v1199_v22 = vadd.f32 -0.1, %v740_v18  ;;  %v1276_v28 = vpack.c.bf16 %v657_v26, %v656_v25  ;;  %v660_v33 = vld [vmem:[%s2052_s1 + $0x60] sm:$0xff]  ;;  %v661_v34 = vld [vmem:[%s2052_s1 + $0x68] sm:$0xff]  ;;  %v752_v42 = vsub.s32 3, %v2084_v8 }
  0xc5   : > { %v744_v13 = vld [vmem:[%s640_s24] sm:$0xff]  ;;  %v659_v30 = vld [vmem:[%s2052_s1 + $0x58] sm:$0xff]  ;;  %v1282_v35 = vpack.c.bf16 %v661_v34, %v660_v33  ;;  %v662_v36 = vld [vmem:[%s2052_s1 + $0x70] sm:$0xff]  ;;  %v759_v47 = vsub.s32 0, %v2084_v8  ;;  %v764_v48 = vsub.s32 1, %v2084_v8  ;;  %s1542_s21 = scalar_lea.vmem %s821_s4, 128 }
  0xc6   : > { %v777_v17 = vrot.slane %v744_v13, %v776_v10  ;;  %v1279_v32 = vpack.c.bf16 %v659_v30, %v658_v29  ;;  %v663_v37 = vld [vmem:[%s2052_s1 + $0x78] sm:$0xff]  ;;  %v647_v39 = vld [vmem:[%s2281_s0] sm:$0xff]  ;;  %v748_v41 = vrot.slane %v744_v13, %v747_v40  ;;  %v753_v44 = vrot.slane %v744_v13, %v752_v42  ;;  %s790_s1 = scalar_lea.sflag [#allocation5], %s2048_s20  ;;  %p1543_p0 = scmp.ne.s32.totalorder %s821_s4, %s1542_s21 }
  0xc7   : > { %1268 = vmatpush3.bf16.msra.mxu0 %v1267_v9  ;;  %v1285_v38 = vpack.c.bf16 %v663_v37, %v662_v36  ;;  %v760_v49 = vrot.slane %v744_v13, %v759_v47  ;;  %v765_v50 = vrot.slane %v744_v13, %v764_v48  ;;  %v741_v51 = vld [vmem:[%s537_s29] sm:$0xff]  ;;  %p2340_p2 = scmp.ne.s32.totalorder %s2321_s26, 0  ;;  %s1737_s11 = smov [#allocation12]  }
  0xc8   : > { %1269 = vmatprep.subr.bf16.mxu0 %v1734_v0  ;;  %v778_v21 = vmul.f32 %v777_v17, %v742_v19  ;;  %v749_v43 = vmul.f32 %v748_v41, %v742_v19  ;;  %s1546_s18 = sshll.u32 %s1737_s11, 4  ;;  %s1547_s18 = int_to_ptr.vmem [resolvable:$false] %s1546_s18 }
  0xc9   : > { %v761_v52 = vmul.f32 %v760_v49, %v740_v18  ;;  %v766_v53 = vmul.f32 %v765_v50, %v741_v51  ;;  %v770_v56 = vmul.f32 %v765_v50, %v740_v18  ;;  %v771_v57 = vmul.f32 %v760_v49, %v741_v51  ;;  %p1544_p3 = pnand %p1543_p0, %p2340_p2  ;;  %s1548_s16 = scalar_lea.vmem %s1547_s18, 256 }
  0xca   : > { %v2101_v24 = vadd.f32 %v778_v21, %v743_v20  ;;  %v754_v45 = vsub.f32 %v753_v44, %v749_v43  ;;  %p1549_p11 = scmp.lt.s32.totalorder %s821_s4, %s1547_s18  ;;  %p1550_p7 = scmp.lt.s32.totalorder %s1548_s16, %s1542_s21 }
  0xcb   : > { %1271 = vmatpush3.bf16.msra.mxu0 %v1270_v14  ;;  %v767_v55 = vsub.f32 %v761_v52, %v766_v53  ;;  %v772_v59 = vadd.f32 %v771_v57, %v770_v56  ;;  %p1545_p5 = pneg %p1544_p3 }
  0xcc   : > { %1272 = vmatprep.subr.bf16.mxu0 %v1734_v0  ;;  %v781_v27 = vsub.f32 %v1199_v22, %v2101_v24  ;;  %v755_v46 = vmul.f32 1.442695, %v754_v45  ;;  %p1551_p1 = por %p1550_p7, %p1549_p11 }
  0xce   : > { %vm782_vm1 = vcmp.gt.f32.partialorder %v781_v27, 0.0  ;;  %1390 = vpow2.f32 %v755_v46  ;;  %p1552_p13 = pnand %p1551_p1, %p1545_p5 }
  0xcf   : > { %1274 = vmatpush3.bf16.msra.mxu0 %v1273_v23  ;;  %v1200_v31 = vsel %vm782_vm1, 1.0, %v1736_v1 }
  0xd0   : > { %1275 = vmatprep.subr.bf16.mxu0 %v1734_v0  ;;  %785 = vst [vmem:[%s607_s8] sm:$0xff] %v1200_v31 }
  0xd3   : > { %1277 = vmatpush3.bf16.msra.mxu0 %v1276_v28 }
  0xd4   : > { %1278 = vmatprep.subr.bf16.mxu0 %v1734_v0 }
  0xd7   : > { %1280 = vmatpush3.bf16.msra.mxu0 %v1279_v32 }
  0xd8   : > { %1281 = vmatprep.subr.bf16.mxu0 %v1734_v0  ;;  %v1391_v54 = vpop.eup %1390 }
  0xd9   : > { %v2129_v58 = vmul.f32 %v1391_v54, %v767_v55  ;;  %v773_v60 = vmul.f32 %v1391_v54, %v772_v59 }
  0xdb   : > { %1283 = vmatpush3.bf16.msra.mxu0 %v1282_v35 }
  0xdc   : > { %1284 = vmatprep.subr.bf16.mxu0 %v1734_v0 }
  0xdf   : > { %1286 = vmatpush3.bf16.msra.mxu0 %v1285_v38 }
  0xe2   : > { %1261 = vmatmul.mubr.f32.vlgmr.msra.gmra.mrb[0].mxu0 %v647_v39 }
  0xe3   : > { %1555 = shalt.err (!%p1552_p13)
}
  0xe4   : > { %s1556_s23 = scalar_lea.hbm %s2138_s10, 128  ;;  %s1560_s25 = scalar_lea.hbm %s2288_s7, 256 }
  0xe5   : > { %p1557_p10 = scmp.ne.s32.totalorder %s2138_s10, %s1556_s23  ;;  %p1561_p8 = scmp.lt.u32.totalorder %s2138_s10, %s2288_s7 }
  0xe6   : > { %p1562_p4 = scmp.lt.u32.totalorder %s1560_s25, %s1556_s23  ;;  %p1564_p0 = scmp.lt.u32.totalorder %s1556_s23, %s2138_s10 }
  0xe7   : > { %p1558_p6 = pnand %p1557_p10, %p2340_p2 }
  0xe8   : > { %p1563_p12 = por %p1562_p4, %p1561_p8 }
  0xe9   : > { %p1559_p9 = pneg %p1558_p6 }
  0xea   : > { %p1565_p3 = por %p1564_p0, %p1563_p12 }
  0xec   : > { %p1566_p5 = pnand %p1565_p3, %p1559_p9 }
  0xee   : > { %1569 = shalt.err (!%p1566_p5)
}
  0xef   : > { %1297 = dma.vmem_to_hbm [thread:$0]  (%p2340_p2), %s821_s4, 128, %s2138_s10, %s790_s1  }
  0xf0   : > { %s621_s24 = scalar_lea.vmem [#allocation15], %s2062_s13  ;;  %s628_s27 = scalar_lea.vmem [#allocation16], %s2062_s13 }
  0xf1   : > { %787 = vst [vmem:[%s621_s24] sm:$0xff] %v773_v60  ;;  %788 = vst [vmem:[%s628_s27] sm:$0xff] %v2101_v24  ;;  %s2341_s30 = sld [smem:[#allocation36_spill]]  ;;  %s865_s2 = sshll.u32 %s628_s27, 4  ;;  %s866_s2 = int_to_ptr.vmem [resolvable:$true] %s865_s2 }
  0xf2   : > { %s805_s21 = scalar_lea.sflag [#allocation17], %s2048_s20  ;;  %s1570_s11 = scalar_lea.vmem %s866_s2, 128 }
  0xf3   : > { %p1571_p11 = scmp.ne.s32.totalorder %s866_s2, %s1570_s11  ;;  %s1738_s10 = smov [#allocation16]  }
  0xf4   : > { %s1574_s4 = sshll.u32 %s1738_s10, 4  ;;  %s1575_s4 = int_to_ptr.vmem [resolvable:$false] %s1574_s4 }
  0xf5   : > { %p1572_p7 = pnand %p1571_p11, %p2340_p2  ;;  %s1576_s1 = scalar_lea.vmem %s1575_s4, 256 }
  0xf6   : > { %p1577_p13 = scmp.lt.s32.totalorder %s866_s2, %s1575_s4  ;;  %p1578_p10 = scmp.lt.s32.totalorder %s1576_s1, %s1570_s11 }
  0xf7   : > { %s2169_s9 = scalar_lea.hbm %s2341_s30, %s2132_s22  ;;  %p1573_p1 = pneg %p1572_p7 }
  0xf8   : > { %p1579_p6 = por %p1578_p10, %p1577_p13 }
  0xfa   : > { %p1580_p9 = pnand %p1579_p6, %p1573_p1 }
  0xfc   : > { %1583 = shalt.err (!%p1580_p9)
}
  0xfd   : > { %s1584_s20 = scalar_lea.hbm %s2169_s9, 128  ;;  %s1588_s23 = scalar_lea.hbm %s2341_s30, 256 }
  0xfe   : > { %p1585_p8 = scmp.ne.s32.totalorder %s2169_s9, %s1584_s20  ;;  %p1589_p0 = scmp.lt.u32.totalorder %s2169_s9, %s2341_s30 }
  0xff   : > { %p1590_p3 = scmp.lt.u32.totalorder %s1588_s23, %s1584_s20  ;;  %p1592_p11 = scmp.lt.u32.totalorder %s1584_s20, %s2169_s9 }
 0x100   : > { %p1586_p4 = pnand %p1585_p8, %p2340_p2 }
 0x101   : > { %p1591_p5 = por %p1590_p3, %p1589_p0 }
 0x102   : > { %p1587_p12 = pneg %p1586_p4 }
 0x103   : > { %p1593_p7 = por %p1592_p11, %p1591_p5 }
 0x105   : > { %p1594_p1 = pnand %p1593_p7, %p1587_p12 }
 0x107   : > { %1597 = shalt.err (!%p1594_p1)
}
 0x108   : > { %1300 = dma.vmem_to_hbm [thread:$0]  (%p2340_p2), %s866_s2, 128, %s2169_s9, %s805_s21  }
 0x109   : > { %s614_s25 = scalar_lea.vmem [#allocation13], %s2062_s13  ;;  %s850_s28 = sshll.u32 %s621_s24, 4  ;;  %s2207_s28 = int_to_ptr.vmem [resolvable:$true] %s850_s28 }
 0x10a   : > { %s835_s15 = sshll.u32 %s614_s25, 4  ;;  %s2342_s17 = sld [smem:[#allocation34_spill]]  ;;  %s2199_s15 = int_to_ptr.vmem [resolvable:$true] %s835_s15 }
 0x10b   : > { %s2344_s20 = sld [smem:[#allocation35_spill]]  ;;  %s795_s13 = scalar_lea.sflag [#allocation14], %s2059_s12 }
 0x10c   : > { %s1598_s24 = scalar_lea.vmem %s2199_s15, 128  ;;  %s1739_s2 = smov [#allocation13]  }
 0x10d   : > { %p1599_p13 = scmp.ne.s32.totalorder %s2199_s15, %s1598_s24  ;;  %s1602_s21 = sshll.u32 %s1739_s2, 4  ;;  %s1603_s21 = int_to_ptr.vmem [resolvable:$false] %s1602_s21 }
 0x10e   : > { %s1604_s18 = scalar_lea.vmem %s1603_s21, 256  ;;  %p1605_p9 = scmp.lt.s32.totalorder %s2199_s15, %s1603_s21 }
 0x10f   : > { %p1600_p10 = pnand %p1599_p13, %p2340_p2  ;;  %p1606_p8 = scmp.lt.s32.totalorder %s1604_s18, %s1598_s24 }
 0x110   : > { %s2343_s11 = smov %s2342_s17  ;;  %s2197_s10 = scalar_lea.hbm %s2342_s17, %s2132_s22 }
 0x111   : > { %s2205_s9 = scalar_lea.hbm %s2344_s20, %s2132_s22  ;;  %p1601_p6 = pneg %p1600_p10 }
 0x112   : > { %p1607_p4 = por %p1606_p8, %p1605_p9 }
 0x114   : > { %p1608_p12 = pnand %p1607_p4, %p1601_p6 }
 0x1b5   : > { %v730_v61 = vpop.f32.mrb[0].mxu0 }
 0x1b6   : > { %v769_v62 = vadd.f32 %v2129_v58, %v730_v61  ;;  %v1262_v63 = vpop.f32.mrb[1].mxu0 }
 0x1b8   : > { %786 = vst [vmem:[%s614_s25] sm:$0xff] %v769_v62 }
 0x1b9   : > { %1611 = shalt.err (!%p1608_p12)
}
 0x1ba   : > { %s1612_s22 = scalar_lea.hbm %s2197_s10, 128  ;;  %s1616_s29 = scalar_lea.hbm %s2343_s11, 256 }
 0x1bb   : > { %p1613_p0 = scmp.ne.s32.totalorder %s2197_s10, %s1612_s22  ;;  %p1617_p11 = scmp.lt.u32.totalorder %s2197_s10, %s2343_s11 }
 0x1bc   : > { %p1618_p7 = scmp.lt.u32.totalorder %s1616_s29, %s1612_s22  ;;  %p1620_p13 = scmp.lt.u32.totalorder %s1612_s22, %s2197_s10 }
 0x1bd   : > { %p1614_p3 = pnand %p1613_p0, %p2340_p2 }
 0x1be   : > { %p1619_p1 = por %p1618_p7, %p1617_p11 }
 0x1bf   : > { %p1615_p5 = pneg %p1614_p3 }
 0x1c0   : > { %p1621_p10 = por %p1620_p13, %p1619_p1 }
 0x1c2   : > { %p1622_p6 = pnand %p1621_p10, %p1615_p5 }
 0x1c4   : > { %1625 = shalt.err (!%p1622_p6)
}
 0x1c5   : > { %1298 = dma.vmem_to_hbm [thread:$0]  (%p2340_p2), %s2199_s15, 128, %s2197_s10, %s795_s13  }
 0x1c6   : > { %s1626_s27 = scalar_lea.vmem %s2207_s28, 128  ;;  %s1740_s8 = smov [#allocation15]  }
 0x1c7   : > { %p1627_p9 = scmp.ne.s32.totalorder %s2207_s28, %s1626_s27  ;;  %s1630_s17 = sshll.u32 %s1740_s8, 4  ;;  %s1631_s17 = int_to_ptr.vmem [resolvable:$false] %s1630_s17 }
 0x1c8   : > { %s1632_s4 = scalar_lea.vmem %s1631_s17, 256  ;;  %p1633_p12 = scmp.lt.s32.totalorder %s2207_s28, %s1631_s17 }
 0x1c9   : > { %p1628_p8 = pnand %p1627_p9, %p2340_p2  ;;  %p1634_p0 = scmp.lt.s32.totalorder %s1632_s4, %s1626_s27 }
 0x1cb   : > { %p1629_p4 = pneg %p1628_p8  ;;  %p1635_p3 = por %p1634_p0, %p1633_p12 }
 0x1cd   : > { %p1636_p5 = pnand %p1635_p3, %p1629_p4 }
 0x1cf   : > { %1639 = shalt.err (!%p1636_p5)
}
 0x1d0   : > { %s1640_s15 = scalar_lea.hbm %s2205_s9, 128  ;;  %s1644_s24 = scalar_lea.hbm %s2344_s20, 256 }
 0x1d1   : > { %p1641_p11 = scmp.ne.s32.totalorder %s2205_s9, %s1640_s15  ;;  %p1645_p13 = scmp.lt.u32.totalorder %s2205_s9, %s2344_s20 }
 0x1d2   : > { %p1646_p10 = scmp.lt.u32.totalorder %s1644_s24, %s1640_s15  ;;  %p1648_p9 = scmp.lt.u32.totalorder %s1640_s15, %s2205_s9 }
 0x1d3   : > { %p1642_p7 = pnand %p1641_p11, %p2340_p2 }
 0x1d4   : > { %p1647_p6 = por %p1646_p10, %p1645_p13 }
 0x1d5   : > { %p1643_p1 = pneg %p1642_p7 }
 0x1d6   : > { %p1649_p8 = por %p1648_p9, %p1647_p6 }
 0x1d8   : > { %p1650_p4 = pnand %p1649_p8, %p1643_p1 }
 0x1da   : > { %1653 = shalt.err (!%p1650_p4)
}
 0x1db   : > { %1299 = dma.vmem_to_hbm [thread:$0]  (%p2340_p2), %s2207_s28, 128, %s2205_s9, %s795_s13  }
 0x1dc PF: > { %s2345_s18 = sld [smem:[#allocation24_spill]]  ;;  %s2346_s22 = sld [smem:[#allocation30_spill]] }
 0x1dd   : > { %s2347_s16 = sld [smem:[#allocation27_spill]] }
 0x1e2   : > { %s877_s23 = sand.u32 1, %s2345_s18   ;;  %p2348_p12 = scmp.ne.s32.totalorder %s2346_s22, 0 }
 0x1e3   : > { %p2349_p0 = scmp.ge.s32.totalorder %s2347_s16, 2  ;;  %s878_s29 = scalar_lea.sflag [#allocation5], %s877_s23 }
 0x1e5   : > { %p1322_p3 = pnand %p2349_p0, %p2348_p12 }
 0x1e7   : > { %1691 = dma.done.wait (!%p1322_p3), %s878_s29, 128  }
 0x1e8   : > { %1693 = vsyncadd (!%p1322_p3), %s878_s29, 4294967168  ;;  %s2350_s19 = sadd.s32 4294967294, %s2347_s16  }
 0x1e9   : > { %s886_s25 = sand.u32 1, %s2350_s19  }
 0x1ea   : > { %s887_s26 = scalar_lea.sflag [#allocation14], %s886_s25 }
 0x1eb   : > { %1695 = dma.done.wait (!%p1322_p3), %s887_s26, 256  }
 0x1ec   : > { %1697 = vsyncadd (!%p1322_p3), %s887_s26, 4294967040  ;;  %s905_s12 = scalar_lea.sflag [#allocation17], %s877_s23 }
 0x1ed   : > { %1699 = dma.done.wait (!%p1322_p3), %s905_s12, 128  }
 0x1ee   : > { %1701 = vsyncadd (!%p1322_p3), %s905_s12, 4294967168  ;;  %s39_s18 = sadd.s32 1, %s2347_s16   ;;  %s2351_s28 = sld [smem:[#allocation25_spill]] }
 0x1ef   : > { %p36_p2 = scmp.ge.s32.totalorder %s39_s18, 4   ;;  %s2352_s15 = sld [smem:[#allocation29_spill]] }
 0x1f0   : > { %s2353_s16 = sld [smem:[#allocation26_spill]]  ;;  %s2354_s17 = sld [smem:[#allocation28_spill]] }
 0x1f1   : > { %s2355_s13 = smov %s1708_s14  ;;  %38 = sbr.rel (!%p36_p2) target bundleno = 21 (0x15), region = 204 }
 0x1f4   : > { %s2356_s14 = smov %s2351_s28 }
 0x1f8   :  { %910 = vsyncpa [#allocation4], 1 }
 0x1f9   :  { %912 = vsyncpa [#allocation4 + $0x1], 1 }
 0x1fa   :  { %913 = vsyncpa [#allocation7], 1 }
 0x1fb   :  { %915 = vsyncpa [#allocation7 + $0x1], 1 }
 0x1fc   :  { %916 = vsyncpa [#allocation10], 1 }
 0x1fd   :  { %918 = vsyncpa [#allocation10 + $0x1], 1 }
 0x1fe   :  { %919 = vsyncpa [#allocation5], 1 }
 0x1ff   :  { %921 = vsyncpa [#allocation5 + $0x1], 1 }
 0x200   :  { %922 = vsyncpa [#allocation14], 1 }
 0x201   :  { %924 = vsyncpa [#allocation14 + $0x1], 1 }
 0x202   :  { %925 = vsyncpa [#allocation17], 1 }
 0x203   :  { %927 = vsyncpa [#allocation17 + $0x1], 1 }

</bundles_post_ra>
